<compile_context>
chip_gen: v5e
topology: v5e:2x2
jax: 0.10.0
libtpu: 0.0.40
codegen_flags: <defaults>
</compile_context>

<pallas_src>
import functools

import jax
import jax.numpy as jnp
from jax.experimental import pallas as pl
from jax.experimental.pallas import tpu as pltpu


def _round_up(x, m):
    return ((x + m - 1) // m) * m


# ----------------------------------------------------------------------------
# Pallas kernel: highway1 -> dropout(0.2) -> highway2 on (tm, D) row tiles.
# HighwayCell(x) = g * relu(Wt x + bt) + (1 - g) * x,  g = sigmoid(Wg x + bg)
# Weights arrive fused as W = [Wg | Wt] (D, 2D) bf16, b = [bg | bt] (1, 2D) f32.
# ----------------------------------------------------------------------------
def _highway_stack_kernel(seed_ref,                      # scalar prefetch (SMEM)
                          x_ref,                         # (tm, D) bf16 rows
                          w1_ref, b1_ref,                # fused highway1
                          w2_ref, b2_ref,                # fused highway2
                          o_ref,
                          *, d, training, p_drop):
    x_bf = x_ref[...]                       # bf16 straight into the MXU
    x = x_bf.astype(jnp.float32)            # f32 copy for the blend path

    # hoist bias reads (one broadcast per grid step, not per dot expression)
    b1 = b1_ref[...]
    b2 = b2_ref[...]

    # ---- highway 1: one fused [gate|transform] matmul, bf16 ops / f32 acc ----
    h1 = jnp.dot(x_bf, w1_ref[...],
                 preferred_element_type=jnp.float32) + b1           # (tm, 2D)
    g1 = jax.nn.sigmoid(h1[:, :d])
    t1 = jnp.maximum(h1[:, d:], 0.0)
    y = g1 * t1 + (1.0 - g1) * x

    # ---- dropout(p=0.2): integer-threshold compare on raw PRNG bits ----
    if training:
        # per-row-tile seed offset so every grid step (even when sharded
        # across cores) draws an independent stream
        pltpu.prng_seed(seed_ref[0] + pl.program_id(0))
        bits = pltpu.bitcast(pltpu.prng_random_bits(y.shape), jnp.uint32)
        thresh = jnp.uint32(int(p_drop * (1 << 32)))
        y = jnp.where(bits >= thresh, y * (1.0 / (1.0 - p_drop)), 0.0)
    # eval mode: identity (matches nn.Dropout in .eval())

    # ---- highway 2 ----
    h2 = jnp.dot(y.astype(jnp.bfloat16), w2_ref[...],
                 preferred_element_type=jnp.float32) + b2           # (tm, 2D)
    g2 = jax.nn.sigmoid(h2[:, :d])
    t2 = jnp.maximum(h2[:, d:], 0.0)
    o_ref[...] = (g2 * t2 + (1.0 - g2) * y).astype(o_ref.dtype)


def highway_stack(x, params, *, training=False, seed=0, tm=1024,
                  out_dtype=jnp.bfloat16):
    """x: (N, D) -> (N, D) through highway1 / dropout / highway2."""
    N, D = x.shape
    assert D % 128 == 0, "feature dim must be a multiple of 128 lanes"

    # Fuse gate|transform weights: one (D, 2D) matmul per highway cell.
    # Matmul operands bf16 (MXU); biases / accumulation / elementwise f32.
    w1 = jnp.concatenate([params["wg1"], params["wt1"]], axis=1).astype(jnp.bfloat16)
    b1 = jnp.concatenate([params["bg1"], params["bt1"]], axis=1).astype(jnp.float32)
    w2 = jnp.concatenate([params["wg2"], params["wt2"]], axis=1).astype(jnp.bfloat16)
    b2 = jnp.concatenate([params["bg2"], params["bt2"]], axis=1).astype(jnp.float32)

    # Row tile: as big as possible to amortize per-step overhead, but keep
    # >= 2 grid steps so v7x's two TensorCores both get rows.  bf16 blocks
    # need the sublane (second-minor) dim to be a multiple of 16 unless the
    # block covers the full array extent.
    tm = max(16, min(tm, _round_up(pl.cdiv(N, 2), 16)))
    if tm >= N:
        tm = N                          # single full-extent block (always legal)
    grid = (pl.cdiv(N, tm),)            # ragged last tile: OOB reads are garbage
                                        # (harmless, rows independent), OOB
                                        # writes are masked — no pad / trim.

    seed_arr = jnp.asarray([seed], dtype=jnp.int32)

    row_spec = pl.BlockSpec((tm, D), lambda i, s: (i, 0))
    mat_spec = pl.BlockSpec((D, 2 * D), lambda i, s: (0, 0))
    vec_spec = pl.BlockSpec((1, 2 * D), lambda i, s: (0, 0))

    kernel = functools.partial(_highway_stack_kernel, d=D,
                               training=training, p_drop=0.2)

    return pl.pallas_call(
        kernel,
        out_shape=jax.ShapeDtypeStruct((N, D), out_dtype),
        grid_spec=pltpu.PrefetchScalarGridSpec(
            num_scalar_prefetch=1,
            grid=grid,
            in_specs=[
                row_spec,            # x rows (bf16)
                mat_spec, vec_spec,  # highway1 fused W, b
                mat_spec, vec_spec,  # highway2 fused W, b
            ],
            out_specs=row_spec,
        ),
        compiler_params=pltpu.CompilerParams(
            dimension_semantics=("parallel",),     # row tiles are independent
            vmem_limit_bytes=48 * 1024 * 1024,     # room for big tiles, < v7x 64 MiB
        ),
    )(seed_arr, x.astype(jnp.bfloat16), w1, b1, w2, b2)


# ----------------------------------------------------------------------------
# EmbeddingLayer forward (embedding lookups + concat are XLA glue — bf16
# tables mean the whole prologue and the kernel input move half the HBM bytes;
# the highway stack is the Pallas hot path).
# ----------------------------------------------------------------------------
def embedding_layer_forward(char_data, word_data, params, *, training=False,
                            seed=0, tm=1024, out_dtype=jnp.bfloat16):
    # char embed: lookup (B,S,W,Ce) -> max over char positions -> (B,S,Ce)
    char_emb = jnp.max(jnp.take(params["char_emb"], char_data, axis=0), axis=2)
    # word embed (from_pretrained vocab_vectors): (B,S,Dw)
    word_emb = jnp.take(params["word_emb"], word_data, axis=0)
    data = jnp.concatenate([char_emb, word_emb], axis=2)          # (B,S,D) bf16
    B, S, D = data.shape
    out = highway_stack(data.reshape(B * S, D), params,
                        training=training, seed=seed, tm=tm, out_dtype=out_dtype)
    return out.reshape(B, S, D)


# ----------------------------------------------------------------------------
# Deterministic parameter init (shapes implied by the module __init__).
# Embedding tables stored bf16 (halves gather HBM traffic; highway params kept
# f32 master copies, cast to bf16/f32 at the kernel boundary).
# ----------------------------------------------------------------------------
def init_params(key, *, vocab_size, word_dim, char_size, char_emb_length):
    D = char_emb_length + word_dim
    ks = jax.random.split(key, 10)
    scale = 1.0 / jnp.sqrt(D)
    return {
        # nn.Embedding.from_pretrained(vocab_vectors)
        "word_emb": jax.random.normal(ks[0], (vocab_size, word_dim),
                                      jnp.float32).astype(jnp.bfloat16),
        # CharEmbed(char_size) -> embedding table (char_size, char_emb_length)
        "char_emb": jax.random.normal(ks[1], (char_size, char_emb_length),
                                      jnp.float32).astype(jnp.bfloat16),
        # HighwayCell 1 (gate + transform linears, stored (in, out))
        "wg1": jax.random.uniform(ks[2], (D, D), jnp.float32, -scale, scale),
        "bg1": jax.random.uniform(ks[3], (1, D), jnp.float32, -scale, scale),
        "wt1": jax.random.uniform(ks[4], (D, D), jnp.float32, -scale, scale),
        "bt1": jax.random.uniform(ks[5], (1, D), jnp.float32, -scale, scale),
        # HighwayCell 2
        "wg2": jax.random.uniform(ks[6], (D, D), jnp.float32, -scale, scale),
        "bg2": jax.random.uniform(ks[7], (1, D), jnp.float32, -scale, scale),
        "wt2": jax.random.uniform(ks[8], (D, D), jnp.float32, -scale, scale),
        "bt2": jax.random.uniform(ks[9], (1, D), jnp.float32, -scale, scale),
    }


if __name__ == "__main__":
    # small shapes: batch=2, seq=8, word-length=6, vocab=50,
    # word_dim=96, char_emb_length=32  => D = 128
    B, S, W = 2, 8, 6
    vocab_size, word_dim = 50, 96
    char_size, char_emb_length = 30, 32

    key = jax.random.PRNGKey(0)
    kp, kc, kw = jax.random.split(key, 3)

    params = init_params(kp, vocab_size=vocab_size, word_dim=word_dim,
                         char_size=char_size, char_emb_length=char_emb_length)

    char_data = jax.random.randint(kc, (B, S, W), 0, char_size, dtype=jnp.int32)
    word_data = jax.random.randint(kw, (B, S), 0, vocab_size, dtype=jnp.int32)

    out = embedding_layer_forward(char_data, word_data, params,
                                  training=False, seed=0)
    jax.block_until_ready(out)

    # sanity: reference in plain JAX (eval-mode dropout == identity).
    # Tables are already bf16-valued, so both references see the same inputs.
    def ref(char_data, word_data, p, *, bf16_matmul):
        ce = jnp.max(jnp.take(p["char_emb"].astype(jnp.float32), char_data,
                              axis=0), axis=2)
        we = jnp.take(p["word_emb"].astype(jnp.float32), word_data, axis=0)
        x = jnp.concatenate([ce, we], axis=2)

        def dot(a, w):
            if bf16_matmul:
                return jnp.dot(a.astype(jnp.bfloat16), w.astype(jnp.bfloat16),
                               preferred_element_type=jnp.float32)
            return jnp.dot(a, w)

        def hw(a, wg, bg, wt, bt):
            g = jax.nn.sigmoid(dot(a, wg) + bg)
            t = jnp.maximum(dot(a, wt) + bt, 0.0)
            return g * t + (1.0 - g) * a

        y = hw(x, p["wg1"], p["bg1"], p["wt1"], p["bt1"])
        return hw(y, p["wg2"], p["bg2"], p["wt2"], p["bt2"])

    ref_bf16 = ref(char_data, word_data, params, bf16_matmul=True)
    ref_f32 = ref(char_data, word_data, params, bf16_matmul=False)

    D = char_emb_length + word_dim
    assert out.shape == (B, S, D)
    assert out.dtype == jnp.bfloat16
    out_f32 = out.astype(jnp.float32)
    # tight check against matched math (bf16 MXU operands, f32 accumulation,
    # bf16 output rounding)
    assert jnp.allclose(out_f32, ref_bf16, atol=2e-2, rtol=2e-2)
    # loose check against the exact f32 module semantics
    assert jnp.allclose(out_f32, ref_f32, atol=6e-2, rtol=6e-2)

    print("KERNEL_OK")
</pallas_src>

<mosaic_0001>
module attributes {stable_mosaic.version = 11 : i64} {
  func.func @_highway_stack_kernel(%arg0: i32, %arg1: memref<1xi32, #tpu.memory_space<smem>>, %arg2: memref<16x128xbf16, #tpu.memory_space<vmem>>, %arg3: memref<128x256xbf16, #tpu.memory_space<vmem>>, %arg4: memref<1x256xf32, #tpu.memory_space<vmem>>, %arg5: memref<128x256xbf16, #tpu.memory_space<vmem>>, %arg6: memref<1x256xf32, #tpu.memory_space<vmem>>, %arg7: memref<16x128xbf16, #tpu.memory_space<vmem>>) attributes {dimension_semantics = [#tpu.dimension_semantics<parallel>], iteration_bounds = array<i64: 1>, scalar_prefetch = 1 : i64, scratch_operands = 0 : i64, tpu.core_type = #tpu.core_type<tc>, window_params = [{transform_indices = @transform_0, window_bounds = array<i64: 16, 128>}, {pipeline_mode = #tpu.pipeline_mode<synchronous>, transform_indices = @transform_1, window_bounds = array<i64: 128, 256>}, {pipeline_mode = #tpu.pipeline_mode<synchronous>, transform_indices = @transform_2, window_bounds = array<i64: 1, 256>}, {pipeline_mode = #tpu.pipeline_mode<synchronous>, transform_indices = @transform_3, window_bounds = array<i64: 128, 256>}, {pipeline_mode = #tpu.pipeline_mode<synchronous>, transform_indices = @transform_4, window_bounds = array<i64: 1, 256>}, {transform_indices = @transform_5, window_bounds = array<i64: 16, 128>}]} {
    %c0 = arith.constant 0 : index
    %c0_0 = arith.constant 0 : index
    %0 = vector.load %arg2[%c0, %c0_0] : memref<16x128xbf16, #tpu.memory_space<vmem>>, vector<16x128xbf16>
    %1 = arith.extf %0 : vector<16x128xbf16> to vector<16x128xf32>
    %c0_1 = arith.constant 0 : index
    %c0_2 = arith.constant 0 : index
    %2 = vector.load %arg4[%c0_1, %c0_2] : memref<1x256xf32, #tpu.memory_space<vmem>>, vector<1x256xf32>
    %c0_3 = arith.constant 0 : index
    %c0_4 = arith.constant 0 : index
    %3 = vector.load %arg6[%c0_3, %c0_4] : memref<1x256xf32, #tpu.memory_space<vmem>>, vector<1x256xf32>
    %c0_5 = arith.constant 0 : index
    %c0_6 = arith.constant 0 : index
    %4 = vector.load %arg3[%c0_5, %c0_6] : memref<128x256xbf16, #tpu.memory_space<vmem>>, vector<128x256xbf16>
    %cst = arith.constant dense<0.000000e+00> : vector<16x256xf32>
    %5 = tpu.matmul %0, %4, %cst {dimension_numbers = #tpu.dot_dimension_numbers<[1], [0], [0], [1], [0, 0, 1, 1], [], []>} : vector<16x128xbf16>, vector<128x256xbf16>, vector<16x256xf32> -> vector<16x256xf32>
    %6 = vector.broadcast %2 : vector<1x256xf32> to vector<16x256xf32>
    %7 = arith.addf %5, %6 : vector<16x256xf32>
    %8 = vector.extract_strided_slice %7 {offsets = [0, 0], sizes = [16, 128], strides = [1, 1]} : vector<16x256xf32> to vector<16x128xf32>
    %9 = arith.negf %8 : vector<16x128xf32>
    %10 = math.exp %9 : vector<16x128xf32>
    %cst_7 = arith.constant 1.000000e+00 : f32
    %11 = vector.broadcast %cst_7 : f32 to vector<16x128xf32>
    %12 = arith.addf %11, %10 : vector<16x128xf32>
    %13 = arith.divf %11, %12 : vector<16x128xf32>
    %14 = vector.extract_strided_slice %7 {offsets = [0, 128], sizes = [16, 128], strides = [1, 1]} : vector<16x256xf32> to vector<16x128xf32>
    %cst_8 = arith.constant 0.000000e+00 : f32
    %15 = vector.broadcast %cst_8 : f32 to vector<16x128xf32>
    %16 = arith.maximumf %14, %15 : vector<16x128xf32>
    %17 = arith.mulf %13, %16 : vector<16x128xf32>
    %cst_9 = arith.constant 1.000000e+00 : f32
    %18 = vector.broadcast %cst_9 : f32 to vector<16x128xf32>
    %19 = arith.subf %18, %13 : vector<16x128xf32>
    %20 = arith.mulf %19, %1 : vector<16x128xf32>
    %21 = arith.addf %17, %20 : vector<16x128xf32>
    %22 = arith.truncf %21 : vector<16x128xf32> to vector<16x128xbf16>
    %c0_10 = arith.constant 0 : index
    %c0_11 = arith.constant 0 : index
    %23 = vector.load %arg5[%c0_10, %c0_11] : memref<128x256xbf16, #tpu.memory_space<vmem>>, vector<128x256xbf16>
    %cst_12 = arith.constant dense<0.000000e+00> : vector<16x256xf32>
    %24 = tpu.matmul %22, %23, %cst_12 {dimension_numbers = #tpu.dot_dimension_numbers<[1], [0], [0], [1], [0, 0, 1, 1], [], []>} : vector<16x128xbf16>, vector<128x256xbf16>, vector<16x256xf32> -> vector<16x256xf32>
    %25 = vector.broadcast %3 : vector<1x256xf32> to vector<16x256xf32>
    %26 = arith.addf %24, %25 : vector<16x256xf32>
    %27 = vector.extract_strided_slice %26 {offsets = [0, 0], sizes = [16, 128], strides = [1, 1]} : vector<16x256xf32> to vector<16x128xf32>
    %28 = arith.negf %27 : vector<16x128xf32>
    %29 = math.exp %28 : vector<16x128xf32>
    %cst_13 = arith.constant 1.000000e+00 : f32
    %30 = vector.broadcast %cst_13 : f32 to vector<16x128xf32>
    %31 = arith.addf %30, %29 : vector<16x128xf32>
    %32 = arith.divf %30, %31 : vector<16x128xf32>
    %33 = vector.extract_strided_slice %26 {offsets = [0, 128], sizes = [16, 128], strides = [1, 1]} : vector<16x256xf32> to vector<16x128xf32>
    %cst_14 = arith.constant 0.000000e+00 : f32
    %34 = vector.broadcast %cst_14 : f32 to vector<16x128xf32>
    %35 = arith.maximumf %33, %34 : vector<16x128xf32>
    %36 = arith.mulf %32, %35 : vector<16x128xf32>
    %cst_15 = arith.constant 1.000000e+00 : f32
    %37 = vector.broadcast %cst_15 : f32 to vector<16x128xf32>
    %38 = arith.subf %37, %32 : vector<16x128xf32>
    %39 = arith.mulf %38, %21 : vector<16x128xf32>
    %40 = arith.addf %36, %39 : vector<16x128xf32>
    %41 = arith.truncf %40 : vector<16x128xf32> to vector<16x128xbf16>
    %c0_16 = arith.constant 0 : index
    %c0_17 = arith.constant 0 : index
    %42 = vector.load %arg7[%c0_16, %c0_17] : memref<16x128xbf16, #tpu.memory_space<vmem>>, vector<16x128xbf16>
    tpu.vector_store %arg7[%c0_16, %c0_17], %41 {strides = array<i32>} : memref<16x128xbf16, #tpu.memory_space<vmem>>, vector<16x128xbf16>,
    return
  }
  func.func @transform_0(%arg0: i32, %arg1: memref<1xi32, #tpu.memory_space<smem>>) -> (i32, i32) {
    %c0_i32 = arith.constant 0 : i32
    %c0_i32_0 = arith.constant 0 : i32
    return %arg0, %c0_i32 : i32, i32
  }
  func.func @transform_1(%arg0: i32, %arg1: memref<1xi32, #tpu.memory_space<smem>>) -> (i32, i32) {
    %c0_i32 = arith.constant 0 : i32
    %c0_i32_0 = arith.constant 0 : i32
    %c0_i32_1 = arith.constant 0 : i32
    return %c0_i32, %c0_i32_0 : i32, i32
  }
  func.func @transform_2(%arg0: i32, %arg1: memref<1xi32, #tpu.memory_space<smem>>) -> (i32, i32) {
    %c0_i32 = arith.constant 0 : i32
    %c0_i32_0 = arith.constant 0 : i32
    %c0_i32_1 = arith.constant 0 : i32
    return %c0_i32, %c0_i32_0 : i32, i32
  }
  func.func @transform_3(%arg0: i32, %arg1: memref<1xi32, #tpu.memory_space<smem>>) -> (i32, i32) {
    %c0_i32 = arith.constant 0 : i32
    %c0_i32_0 = arith.constant 0 : i32
    %c0_i32_1 = arith.constant 0 : i32
    return %c0_i32, %c0_i32_0 : i32, i32
  }
  func.func @transform_4(%arg0: i32, %arg1: memref<1xi32, #tpu.memory_space<smem>>) -> (i32, i32) {
    %c0_i32 = arith.constant 0 : i32
    %c0_i32_0 = arith.constant 0 : i32
    %c0_i32_1 = arith.constant 0 : i32
    return %c0_i32, %c0_i32_0 : i32, i32
  }
  func.func @transform_5(%arg0: i32, %arg1: memref<1xi32, #tpu.memory_space<smem>>) -> (i32, i32) {
    %c0_i32 = arith.constant 0 : i32
    %c0_i32_0 = arith.constant 0 : i32
    return %arg0, %c0_i32 : i32, i32
  }
}

</mosaic_0001>

<bundles_post_ra>
// kernel: tpu_custom_call.1
= control target key start
LH: loop header
LB: loop body
LE: loop exit
PB: predicated region body
PF: predicated region fallthrough
CT: control target
= control target key end

     0   :  { %12 = vsyncpa [#allocation5], 0  ;;  %s832_s0 = inlined_call_operand.<no memory space> [shape: s32[1], index: 0, kind: input, shape index: {}]   ;;  %s833_s1 = inlined_call_operand.hbm [shape: bf16[16,128], index: 1, kind: input, shape index: {}]   ;;  %s834_s2 = inlined_call_operand.hbm [shape: bf16[128,256], index: 2, kind: input, shape index: {}]   ;;  %s835_s3 = inlined_call_operand.vmem [shape: f32[1,256], index: 3, kind: input, shape index: {}]   ;;  %s836_s4 = inlined_call_operand.hbm [shape: bf16[128,256], index: 4, kind: input, shape index: {}]   ;;  %s837_s5 = inlined_call_operand.vmem [shape: f32[1,256], index: 5, kind: input, shape index: {}]   ;;  %s838_s6 = inlined_call_operand.hbm [shape: bf16[16,128], index: 6, kind: output, shape index: {}]  }
   0x1   :  { %13 = vsyncpa [#allocation8], 0  ;;  %s32_s22 = sshll.u32 %s834_s2, 4  ;;  %s33_s22 = int_to_ptr.hbm [resolvable:$true] %s32_s22 }
   0x2   :  { %14 = vsyncpa [#allocation6], 0  ;;  %s761_s23 = smov [#allocation7]   ;;  %s19_s27 = sshll.u32 %s833_s1, 4  ;;  %s20_s27 = int_to_ptr.hbm [resolvable:$true] %s19_s27 }
   0x3   :  { %s34_s24 = sshll.u32 %s761_s23, 4  ;;  %s762_s28 = smov 128   ;;  %s35_s24 = int_to_ptr.vmem [resolvable:$true] %s34_s24 }
   0x4   :  { %s763_s29 = smov 8   ;;  %s764_s30 = smov [#allocation4]  }
   0x5   :  { %40 = dma.hbm_to_vmem [thread:$0]  %s33_s22, 2048, %s35_s24, [#allocation8], %s762_s28, %s762_s28, %s763_s29  }
   0x6   :  { %s21_s7 = sshll.u32 %s764_s30, 4  ;;  %s765_s8 = smov 64   ;;  %s22_s7 = int_to_ptr.vmem [resolvable:$true] %s21_s7 }
   0x7   :  { %s766_s9 = smov 4   ;;  %s47_s11 = sshll.u32 %s836_s4, 4  ;;  %s48_s11 = int_to_ptr.hbm [resolvable:$true] %s47_s11 }
   0x8   :  { %27 = dma.hbm_to_vmem [thread:$0]  %s20_s27, 128, %s22_s7, [#allocation5], %s765_s8, %s765_s8, %s766_s9  }
   0x9   :  { %s767_s12 = smov [#allocation9]  }
   0xa   :  { %s49_s1 = sshll.u32 %s767_s12, 4  ;;  %s50_s1 = int_to_ptr.vmem [resolvable:$true] %s49_s1 }
   0xb   :  { %55 = dma.hbm_to_vmem [thread:$0]  %s48_s11, 2048, %s50_s1, [#allocation8], %s762_s28, %s762_s28, %s763_s29  }
   0xc   :  { %755 = dma.done.wait [#allocation5], 128  }
   0xd   :  { %756 = vsyncadd [#allocation5], 4294967168 }
   0xe   :  { %757 = dma.done.wait [#allocation8], 4096  }
   0xf   :  { %758 = vsyncadd [#allocation8], 4294963200  ;;  %v523_v0 = vld [vmem:[#allocation7 + $0x70] sm:$0xf]  ;;  %v613_v1 = vld [vmem:[#allocation7 + $0x74] sm:$0xf0] }
  0x10   :  { %v515_v2 = vld [vmem:[#allocation7 + $0x60] sm:$0xf]  ;;  %v524_v3 = vor.u32 %v613_v1, %v523_v0  ;;  %v611_v4 = vld [vmem:[#allocation7 + $0x64] sm:$0xf0]  ;;  %v507_v6 = vld [vmem:[#allocation7 + $0x50] sm:$0xf] }
  0x11   :  { %v516_v5 = vor.u32 %v611_v4, %v515_v2  ;;  %v609_v7 = vld [vmem:[#allocation7 + $0x54] sm:$0xf0]  ;;  %v612_v8 = vld [vmem:[#allocation7 + $0x74] sm:$0xf]  ;;  %v525_v9 = vld [vmem:[#allocation7 + $0x78] sm:$0xf0] }
  0x12   :  { %183 = vmatpush.bf16.msra.mxu0 %v524_v3  ;;  %v528_v10 = vor.u32 %v612_v8, %v525_v9  ;;  %v610_v11 = vld [vmem:[#allocation7 + $0x64] sm:$0xf]  ;;  %v517_v12 = vld [vmem:[#allocation7 + $0x68] sm:$0xf0]  ;;  %v508_v13 = vor.u32 %v609_v7, %v507_v6  ;;  %v499_v14 = vld [vmem:[#allocation7 + $0x40] sm:$0xf] }
  0x13   :  { %v520_v15 = vor.u32 %v610_v11, %v517_v12  ;;  %v607_v16 = vld [vmem:[#allocation7 + $0x44] sm:$0xf0]  ;;  %v608_v17 = vld [vmem:[#allocation7 + $0x54] sm:$0xf]  ;;  %v509_v18 = vld [vmem:[#allocation7 + $0x58] sm:$0xf0] }
  0x14   :  { %197 = vmatpush.bf16.msra.mxu1 %v528_v10  ;;  %v500_v19 = vor.u32 %v607_v16, %v499_v14  ;;  %v491_v20 = vld [vmem:[#allocation7 + $0x30] sm:$0xf]  ;;  %v512_v21 = vor.u32 %v608_v17, %v509_v18  ;;  %v605_v22 = vld [vmem:[#allocation7 + $0x34] sm:$0xf0]  ;;  %v606_v23 = vld [vmem:[#allocation7 + $0x44] sm:$0xf] }
  0x15   :  { %v501_v24 = vld [vmem:[#allocation7 + $0x48] sm:$0xf0]  ;;  %v492_v25 = vor.u32 %v605_v22, %v491_v20  ;;  %v483_v26 = vld [vmem:[#allocation7 + $0x20] sm:$0xf]  ;;  %v603_v28 = vld [vmem:[#allocation7 + $0x24] sm:$0xf0] }
  0x16   :  { %184 = vmatpush.bf16.msra.mxu0 %v516_v5  ;;  %v504_v27 = vor.u32 %v606_v23, %v501_v24  ;;  %v604_v29 = vld [vmem:[#allocation7 + $0x34] sm:$0xf]  ;;  %v493_v30 = vld [vmem:[#allocation7 + $0x38] sm:$0xf0]  ;;  %v484_v31 = vor.u32 %v603_v28, %v483_v26  ;;  %v475_v32 = vld [vmem:[#allocation7 + $0x10] sm:$0xf] }
  0x17   :  { %v496_v33 = vor.u32 %v604_v29, %v493_v30  ;;  %v601_v34 = vld [vmem:[#allocation7 + $0x14] sm:$0xf0]  ;;  %v602_v35 = vld [vmem:[#allocation7 + $0x24] sm:$0xf]  ;;  %v485_v36 = vld [vmem:[#allocation7 + $0x28] sm:$0xf0] }
  0x18   :  { %198 = vmatpush.bf16.msra.mxu1 %v520_v15  ;;  %v476_v37 = vor.u32 %v601_v34, %v475_v32  ;;  %v467_v38 = vld [vmem:[#allocation7] sm:$0xf]  ;;  %v488_v39 = vor.u32 %v602_v35, %v485_v36  ;;  %v599_v40 = vld [vmem:[#allocation7 + $0x4] sm:$0xf0]  ;;  %v600_v41 = vld [vmem:[#allocation7 + $0x14] sm:$0xf] }
  0x19   :  { %v477_v42 = vld [vmem:[#allocation7 + $0x18] sm:$0xf0]  ;;  %v468_v43 = vor.u32 %v599_v40, %v467_v38  ;;  %v598_v45 = vld [vmem:[#allocation7 + $0x4] sm:$0xf]  ;;  %v469_v46 = vld [vmem:[#allocation7 + $0x8] sm:$0xf0] }
  0x1a   :  { %185 = vmatpush.bf16.msra.mxu0 %v508_v13  ;;  %v480_v44 = vor.u32 %v600_v41, %v477_v42  ;;  %v597_v47 = vld [vmem:[#allocation4] sm:$0xff]  ;;  %v472_v48 = vor.u32 %v598_v45, %v469_v46  ;;  %v589_v49 = vld [vmem:[#allocation9 + $0x70] sm:$0xf]  ;;  %v628_v51 = vld [vmem:[#allocation9 + $0x74] sm:$0xf]  ;;  %s447_s18 = sshll.u32 %s838_s6, 4  ;;  %s448_s18 = int_to_ptr.hbm [resolvable:$true] %s447_s18 }
  0x1b   :  { %v629_v50 = vld [vmem:[#allocation9 + $0x74] sm:$0xf0]  ;;  %v591_v53 = vld [vmem:[#allocation9 + $0x78] sm:$0xf0]  ;;  %v581_v55 = vld [vmem:[#allocation9 + $0x60] sm:$0xf] }
  0x1c   :  { %199 = vmatpush.bf16.msra.mxu1 %v512_v21  ;;  %v590_v52 = vor.u32 %v629_v50, %v589_v49  ;;  %v594_v54 = vor.u32 %v628_v51, %v591_v53  ;;  %v627_v56 = vld [vmem:[#allocation9 + $0x64] sm:$0xf0]  ;;  %v626_v57 = vld [vmem:[#allocation9 + $0x64] sm:$0xf]  ;;  %v583_v59 = vld [vmem:[#allocation9 + $0x68] sm:$0xf0] }
  0x1d   :  { %v582_v58 = vor.u32 %v627_v56, %v581_v55  ;;  %v586_v60 = vor.u32 %v626_v57, %v583_v59  ;;  %v573_v61 = vld [vmem:[#allocation9 + $0x50] sm:$0xf]  ;;  %v625_v62 = vld [vmem:[#allocation9 + $0x54] sm:$0xf0]  ;;  %v624_v63 = vld [vmem:[#allocation9 + $0x54] sm:$0xf] }
  0x1e   :  { %186 = vmatpush.bf16.msra.mxu0 %v500_v19  ;;  %361 = vmatpush.bf16.msra.mxu2 %v590_v52  ;;  %v574_v0 = vor.u32 %v625_v62, %v573_v61  ;;  %v575_v1 = vld [vmem:[#allocation9 + $0x58] sm:$0xf0]  ;;  %v819_v3 = vld [vmem:[%s835_s3] sm:$0x3]  ;;  %v565_v4 = vld [vmem:[#allocation9 + $0x40] sm:$0xf] }
  0x1f   :  { %375 = vmatpush.bf16.msra.mxu3 %v594_v54  ;;  %v578_v2 = vor.u32 %v624_v63, %v575_v1  ;;  %v623_v5 = vld [vmem:[#allocation9 + $0x44] sm:$0xf0]  ;;  %v622_v6 = vld [vmem:[#allocation9 + $0x44] sm:$0xf]  ;;  %v567_v8 = vld [vmem:[#allocation9 + $0x48] sm:$0xf0] }
  0x20   :  { %200 = vmatpush.bf16.msra.mxu1 %v504_v27  ;;  %v566_v7 = vor.u32 %v623_v5, %v565_v4  ;;  %v570_v9 = vor.u32 %v622_v6, %v567_v8  ;;  %v93_v10 = vperm.slane %v819_v3, 0  ;;  %v557_v11 = vld [vmem:[#allocation9 + $0x30] sm:$0xf]  ;;  %v621_v12 = vld [vmem:[#allocation9 + $0x34] sm:$0xf0]  ;;  %v94_v54 = vperm.slane %v819_v3, 1 }
  0x21   :  { %v620_v13 = vld [vmem:[#allocation9 + $0x34] sm:$0xf]  ;;  %v558_v14 = vor.u32 %v621_v12, %v557_v11  ;;  %v559_v15 = vld [vmem:[#allocation9 + $0x38] sm:$0xf0]  ;;  %v549_v19 = vld [vmem:[#allocation9 + $0x20] sm:$0xf] }
  0x22   :  { %187 = vmatpush.bf16.msra.mxu0 %v492_v25  ;;  %362 = vmatpush.bf16.msra.mxu2 %v582_v58  ;;  %v562_v16 = vor.u32 %v620_v13, %v559_v15  ;;  %v619_v20 = vld [vmem:[#allocation9 + $0x24] sm:$0xf0]  ;;  %v618_v21 = vld [vmem:[#allocation9 + $0x24] sm:$0xf]  ;;  %v551_v23 = vld [vmem:[#allocation9 + $0x28] sm:$0xf0] }
  0x23   :  { %376 = vmatpush.bf16.msra.mxu3 %v586_v60  ;;  %v550_v22 = vor.u32 %v619_v20, %v549_v19  ;;  %v554_v25 = vor.u32 %v618_v21, %v551_v23  ;;  %v541_v26 = vld [vmem:[#allocation9 + $0x10] sm:$0xf]  ;;  %v617_v27 = vld [vmem:[#allocation9 + $0x14] sm:$0xf0]  ;;  %v616_v28 = vld [vmem:[#allocation9 + $0x14] sm:$0xf] }
  0x24   :  { %201 = vmatpush.bf16.msra.mxu1 %v496_v33  ;;  %v542_v29 = vor.u32 %v617_v27, %v541_v26  ;;  %v543_v30 = vld [vmem:[#allocation9 + $0x18] sm:$0xf0]  ;;  %v533_v32 = vld [vmem:[#allocation9] sm:$0xf]  ;;  %v615_v33 = vld [vmem:[#allocation9 + $0x4] sm:$0xf0] }
  0x25   :  { %v534_v35 = vor.u32 %v615_v33, %v533_v32  ;;  %v614_v36 = vld [vmem:[#allocation9 + $0x4] sm:$0xf]  ;;  %v70_v59 = vld [vmem:[#allocation4] sm:$0xff]  }
  0x26   :  { %188 = vmatpush.bf16.msra.mxu0 %v484_v31  ;;  %363 = vmatpush.bf16.msra.mxu2 %v574_v0  ;;  %v546_v31 = vor.u32 %v616_v28, %v543_v30  ;;  %v75_v20 = vld [vmem:[%s837_s5] sm:$0x3]  ;;  %s768_s5 = smov [#allocation10]  }
  0x27   :  { %377 = vmatpush.bf16.msra.mxu3 %v578_v2  ;;  %v72_v2 = vunpack.c.l.bf16 %v70_v59  ;;  %v277_v21 = vperm.slane %v75_v20, 0  ;;  %s445_s15 = sshll.u32 %s768_s5, 4  ;;  %s446_s15 = int_to_ptr.vmem [resolvable:$true] %s445_s15 }
  0x28   :  { %202 = vmatpush.bf16.msra.mxu1 %v488_v39 }
  0x2a   :  { %189 = vmatpush.bf16.msra.mxu0 %v476_v37  ;;  %364 = vmatpush.bf16.msra.mxu2 %v566_v7  ;;  %v535_v37 = vld [vmem:[#allocation9 + $0x8] sm:$0xf0] }
  0x2b   :  { %378 = vmatpush.bf16.msra.mxu3 %v570_v9  ;;  %v538_v39 = vor.u32 %v614_v36, %v535_v37  ;;  %v73_v9 = vunpack.c.h.bf16 %v70_v59 }
  0x2c   :  { %203 = vmatpush.bf16.msra.mxu1 %v480_v44 }
  0x2e   :  { %190 = vmatpush.bf16.msra.mxu0 %v468_v43  ;;  %365 = vmatpush.bf16.msra.mxu2 %v558_v14 }
  0x2f   :  { %379 = vmatpush.bf16.msra.mxu3 %v562_v16 }
  0x30   :  { %204 = vmatpush.bf16.msra.mxu1 %v472_v48 }
  0x31   :  { %191 = vmatmul.bf16.vlgmr.msra.gmra.mxu0 %v597_v47 }
  0x32   :  { %366 = vmatpush.bf16.msra.mxu2 %v550_v22 }
  0x33   :  { %205 = vmatmul.bf16.vlgmr.msra.gmra.mxu1 %v597_v47  ;;  %380 = vmatpush.bf16.msra.mxu3 %v554_v25 }
  0x36   :  { %367 = vmatpush.bf16.msra.mxu2 %v542_v29 }
  0x37   :  { %381 = vmatpush.bf16.msra.mxu3 %v546_v31 }
  0x3a   :  { %368 = vmatpush.bf16.msra.mxu2 %v534_v35 }
  0x3b   :  { %382 = vmatpush.bf16.msra.mxu3 %v538_v39 }
  0xae   :  { %v192_v17 = vpop.f32.mrf.mxu0 }
  0xaf   :  { %v193_v18 = vadd.f32 %v192_v17, %v93_v10 }
  0xb0   :  { %v206_v47 = vpop.f32.mrf.mxu1 }
  0xb1   :  { %v529_v24 = vmul.f32 -1.442695, %v193_v18  ;;  %v207_v63 = vadd.f32 %v206_v47, %v94_v54 }
  0xb3   :  { %643 = vpow2.f32 %v529_v24  ;;  %v249_v7 = vmax.f32 %v207_v63, 0.0 }
  0xb6   :  { %v194_v34 = vpop.f32.mrf.mxu0 }
  0xb7   :  { %v195_v38 = vadd.f32 %v194_v34, %v93_v10 }
  0xb8   :  { %v208_v61 = vpop.f32.mrf.mxu1 }
  0xb9   :  { %v644_v40 = vpop.eup %643  ;;  %v530_v41 = vmul.f32 -1.442695, %v195_v38  ;;  %v209_v5 = vadd.f32 %v208_v61, %v94_v54 }
  0xba   :  { %v217_v42 = vadd.f32 1.0, %v644_v40 }
  0xbb   :  { %645 = vpow2.f32 %v530_v41  ;;  %v250_v11 = vmax.f32 %v209_v5, 0.0 }
  0xbc   :  { %647 = vrcp.f32 %v217_v42  ;;  %v230_v50 = vand.u32 2147483648, %v217_v42  ;;  %vm224_vm1 = vweird.f32 %v217_v42  ;;  %v228_v52 = vand.u32 2147483647, %v217_v42 }
  0xbe   :  { %v231_v57 = vor.u32 1.1754944e-38, %v230_v50  ;;  %vm229_vm3 = vcmp.eq.f32.partialorder %v228_v52, 8.507059e+37 }
  0xc1   :  { %v646_v43 = vpop.eup %645 }
  0xc2   :  { %v648_v44 = vpop.eup %647  ;;  %v218_v45 = vadd.f32 1.0, %v646_v43  ;;  %v278_v43 = vperm.slane %v75_v20, 1 }
  0xc3   :  { %v220_v46 = vmul.f32 %v648_v44, %v217_v42  ;;  %vm225_vm0 = vweird.f32 %v648_v44 }
  0xc4   :  { %649 = vrcp.f32 %v218_v45  ;;  %vm226_vm2 = vmor %vm224_vm1, %vm225_vm0  ;;  %v245_v62 = vand.u32 2147483648, %v218_v45  ;;  %v243_v1 = vand.u32 2147483647, %v218_v45  ;;  %vm239_vm5 = vweird.f32 %v218_v45 }
  0xc5   :  { %v221_v48 = vsub.f32 1.0, %v220_v46 }
  0xc6   :  { %v246_v3 = vor.u32 1.1754944e-38, %v245_v62  ;;  %vm244_vm7 = vcmp.eq.f32.partialorder %v243_v1, 8.507059e+37 }
  0xc7   :  { %v222_v49 = vmul.f32 %v648_v44, %v221_v48 }
  0xc9   :  { %v223_v51 = vadd.f32 %v648_v44, %v222_v49 }
  0xca   :  { %v650_v53 = vpop.eup %649 }
  0xcb   :  { %v227_v55 = vsel %vm226_vm2, %v648_v44, %v223_v51  ;;  %v235_v56 = vmul.f32 %v650_v53, %v218_v45  ;;  %vm240_vm4 = vweird.f32 %v650_v53 }
  0xcc   :  { %v232_v60 = vsel %vm229_vm3, %v231_v57, %v227_v55  ;;  %vm241_vm6 = vmor %vm239_vm5, %vm240_vm4 }
  0xcd   :  { %v236_v58 = vsub.f32 1.0, %v235_v56  ;;  %v253_v4 = vsub.f32 1.0, %v232_v60  ;;  %v251_v14 = vmul.f32 %v249_v7, %v232_v60 }
  0xcf   :  { %v237_v0 = vmul.f32 %v650_v53, %v236_v58  ;;  %v255_v13 = vmul.f32 %v253_v4, %v72_v2 }
  0xd1   :  { %v238_v6 = vadd.f32 %v650_v53, %v237_v0  ;;  %v257_v17 = vadd.f32 %v255_v13, %v251_v14 }
  0xd3   :  { %v242_v8 = vsel %vm241_vm6, %v650_v53, %v238_v6 }
  0xd4   :  { %v247_v10 = vsel %vm244_vm7, %v246_v3, %v242_v8 }
  0xd5   :  { %v254_v12 = vsub.f32 1.0, %v247_v10  ;;  %v252_v15 = vmul.f32 %v250_v11, %v247_v10 }
  0xd7   :  { %v256_v16 = vmul.f32 %v254_v12, %v73_v9 }
  0xd9   :  { %v258_v18 = vadd.f32 %v256_v16, %v252_v15 }
  0xdb   :  { %v259_v19 = vpack.c.bf16 %v258_v18, %v257_v17 }
  0xdd   :  { %369 = vmatmul.bf16.vlgmr.msra.gmra.mxu2 %v259_v19  ;;  %383 = vmatmul.bf16.vlgmr.msra.gmra.mxu3 %v259_v19 }
 0x160   :  { %v370_v22 = vpop.f32.mrf.mxu2  ;;  %v384_v34 = vpop.f32.mrf.mxu3 }
 0x161   :  { %v371_v23 = vadd.f32 %v370_v22, %v277_v21  ;;  %v385_v51 = vadd.f32 %v384_v34, %v278_v43 }
 0x163   :  { %v595_v24 = vmul.f32 -1.442695, %v371_v23  ;;  %v427_v58 = vmax.f32 %v385_v51, 0.0 }
 0x165   :  { %651 = vpow2.f32 %v595_v24 }
 0x168   :  { %v372_v25 = vpop.f32.mrf.mxu2  ;;  %v386_v47 = vpop.f32.mrf.mxu3 }
 0x169   :  { %v373_v26 = vadd.f32 %v372_v25, %v277_v21  ;;  %v387_v53 = vadd.f32 %v386_v47, %v278_v43 }
 0x16b   :  { %v652_v27 = vpop.eup %651  ;;  %v596_v28 = vmul.f32 -1.442695, %v373_v26  ;;  %v428_v60 = vmax.f32 %v387_v53, 0.0 }
 0x16c   :  { %v395_v29 = vadd.f32 1.0, %v652_v27 }
 0x16d   :  { %653 = vpow2.f32 %v596_v28 }
 0x16e   :  { %655 = vrcp.f32 %v395_v29  ;;  %v408_v37 = vand.u32 2147483648, %v395_v29  ;;  %vm402_vm9 = vweird.f32 %v395_v29  ;;  %v406_v39 = vand.u32 2147483647, %v395_v29 }
 0x170   :  { %v409_v44 = vor.u32 1.1754944e-38, %v408_v37  ;;  %vm407_vm11 = vcmp.eq.f32.partialorder %v406_v39, 8.507059e+37 }
 0x173   :  { %v654_v30 = vpop.eup %653 }
 0x174   :  { %v656_v31 = vpop.eup %655  ;;  %v396_v32 = vadd.f32 1.0, %v654_v30 }
 0x175   :  { %v398_v33 = vmul.f32 %v656_v31, %v395_v29  ;;  %vm403_vm8 = vweird.f32 %v656_v31 }
 0x176   :  { %657 = vrcp.f32 %v396_v32  ;;  %vm404_vm10 = vmor %vm402_vm9, %vm403_vm8  ;;  %v423_v48 = vand.u32 2147483648, %v396_v32  ;;  %v421_v50 = vand.u32 2147483647, %v396_v32  ;;  %vm417_vm13 = vweird.f32 %v396_v32 }
 0x177   :  { %v399_v35 = vsub.f32 1.0, %v398_v33 }
 0x178   :  { %v424_v55 = vor.u32 1.1754944e-38, %v423_v48  ;;  %vm422_vm15 = vcmp.eq.f32.partialorder %v421_v50, 8.507059e+37 }
 0x179   :  { %v400_v36 = vmul.f32 %v656_v31, %v399_v35 }
 0x17b   :  { %v401_v38 = vadd.f32 %v656_v31, %v400_v36 }
 0x17c   :  { %v658_v40 = vpop.eup %657 }
 0x17d   :  { %v405_v41 = vsel %vm404_vm10, %v656_v31, %v401_v38  ;;  %v413_v42 = vmul.f32 %v658_v40, %v396_v32  ;;  %vm418_vm12 = vweird.f32 %v658_v40 }
 0x17e   :  { %v410_v46 = vsel %vm407_vm11, %v409_v44, %v405_v41  ;;  %vm419_vm14 = vmor %vm417_vm13, %vm418_vm12 }
 0x17f   :  { %v414_v45 = vsub.f32 1.0, %v413_v42  ;;  %v431_v52 = vsub.f32 1.0, %v410_v46  ;;  %v429_v62 = vmul.f32 %v427_v58, %v410_v46 }
 0x181   :  { %v415_v49 = vmul.f32 %v658_v40, %v414_v45  ;;  %v433_v59 = vmul.f32 %v431_v52, %v257_v17 }
 0x183   :  { %v416_v54 = vadd.f32 %v658_v40, %v415_v49  ;;  %v435_v1 = vadd.f32 %v433_v59, %v429_v62 }
 0x185   :  { %v420_v56 = vsel %vm419_vm14, %v658_v40, %v416_v54 }
 0x186   :  { %v425_v57 = vsel %vm422_vm15, %v424_v55, %v420_v56 }
 0x187   :  { %v432_v61 = vsub.f32 1.0, %v425_v57  ;;  %v430_v63 = vmul.f32 %v428_v60, %v425_v57 }
 0x189   :  { %v434_v0 = vmul.f32 %v432_v61, %v258_v18 }
 0x18b   :  { %v436_v2 = vadd.f32 %v434_v0, %v430_v63 }
 0x18d   :  { %v633_v4 = vpack.c.bf16 %v436_v2, %v435_v1 }
 0x18f   :  { %634 = vst [vmem:[#allocation10] sm:$0xff] %v633_v4  }
 0x190   :  { %453 = dma.vmem_to_hbm [thread:$0]  %s446_s15, 128, %s448_s18, [#allocation6], %s765_s8, %s765_s8, %s766_s9  }
 0x191   :  { %759 = dma.done.wait [#allocation6], 128  }
 0x192   :  { %760 = vsyncadd [#allocation6], 4294967168 }
 0x193   :  { %458 = vsyncpa [#allocation5], 1 }
 0x194   :  { %459 = vsyncpa [#allocation8], 1 }
 0x195   :  { %460 = vsyncpa [#allocation6], 1 }

</bundles_post_ra>
